<compile_context>
chip_gen: v6e
topology: v6e:2x2x1
jax: 0.10.0
libtpu: 0.0.40
codegen_flags: <defaults>
</compile_context>

<pallas_src>
import functools

import jax
import jax.numpy as jnp
from jax.experimental import pallas as pl
from jax.experimental.pallas import tpu as pltpu

BN_EPS = 1e-5
VMEM_LIMIT = 40 * 1024 * 1024     # < 64 MiB physical VMEM on v7x, plenty on v5e/v6e


def _round_up(x, m):
    return x + ((-x) % m)


# --------------------------------------------------------------------------
# Activation helper (used only inside kernels; `act` is a static python str)
# --------------------------------------------------------------------------
def _apply_act(y, act):
    if act == "relu":
        return jnp.maximum(y, 0.0)
    if act == "leaky":                       # LeakyReLU(0.1)
        return jnp.where(y > 0, y, 0.1 * y)
    if act == "sigmoid":
        # exp + approx reciprocal both run on the EUP slot (free vs VALU divide)
        return pl.reciprocal(1.0 + jnp.exp(-y), approx=True)
    if act == "tanh":
        return jnp.tanh(y)
    return y


# --------------------------------------------------------------------------
# Fused matmul kernels:
#   out = merge_act( act((x @ w) * scale + bias) + residual )   (bf16 output)
# --------------------------------------------------------------------------
def _mm_kernel_single(act, merge_act, has_res):
    if has_res:
        def kernel(x_ref, w_ref, s_ref, b_ref, r_ref, o_ref):
            y = jnp.dot(x_ref[...], w_ref[...], preferred_element_type=jnp.float32)
            y = _apply_act(y * s_ref[...] + b_ref[...], act)
            y = y + r_ref[...].astype(jnp.float32)
            o_ref[...] = _apply_act(y, merge_act).astype(o_ref.dtype)
        return kernel

    def kernel(x_ref, w_ref, s_ref, b_ref, o_ref):
        y = jnp.dot(x_ref[...], w_ref[...], preferred_element_type=jnp.float32)
        y = _apply_act(y * s_ref[...] + b_ref[...], act)
        o_ref[...] = y.astype(o_ref.dtype)
    return kernel


def _mm_kernel_acc(act, merge_act, has_res):
    # Fallback path with a K reduction grid axis (only if full-K misses VMEM).
    def _epilogue(y, s, b, r, o_ref):
        y = _apply_act(y * s + b, act)
        if r is not None:
            y = _apply_act(y + r.astype(jnp.float32), merge_act)
        o_ref[...] = y.astype(o_ref.dtype)

    if has_res:
        def kernel(x_ref, w_ref, s_ref, b_ref, r_ref, o_ref, acc_ref):
            @pl.when(pl.program_id(2) == 0)
            def _():
                acc_ref[...] = jnp.zeros_like(acc_ref)
            acc_ref[...] += jnp.dot(x_ref[...], w_ref[...],
                                    preferred_element_type=jnp.float32)

            @pl.when(pl.program_id(2) == pl.num_programs(2) - 1)
            def _():
                _epilogue(acc_ref[...], s_ref[...], b_ref[...], r_ref[...], o_ref)
        return kernel

    def kernel(x_ref, w_ref, s_ref, b_ref, o_ref, acc_ref):
        @pl.when(pl.program_id(2) == 0)
        def _():
            acc_ref[...] = jnp.zeros_like(acc_ref)
        acc_ref[...] += jnp.dot(x_ref[...], w_ref[...],
                                preferred_element_type=jnp.float32)

        @pl.when(pl.program_id(2) == pl.num_programs(2) - 1)
        def _():
            _epilogue(acc_ref[...], s_ref[...], b_ref[...], None, o_ref)
    return kernel


def _pad_to(a, rows, cols):
    pr, pc = rows - a.shape[0], cols - a.shape[1]
    if pr or pc:
        a = jnp.pad(a, ((0, pr), (0, pc)))
    return a


@functools.partial(jax.jit, static_argnames=("act", "merge_act"))
def matmul_fused(x, w, scale, bias, residual=None, *, act="none", merge_act="none"):
    M, K = x.shape
    _, N = w.shape

    xb = x.astype(jnp.bfloat16)              # bf16 MXU operands, f32 accumulation
    wb = w.astype(jnp.bfloat16)

    Np = _round_up(N, 128)
    Kp = _round_up(K, 128)

    # tn: prefer 256-wide tiles (v6e/v7x MXU), keep >=2 j-steps on small-M GEMMs
    if Np % 256 == 0 and (M >= 512 or Np >= 512):
        tn = 256
    else:
        tn = 128

    if M >= 512:                              # big-M encoder/decoder conv GEMMs
        tm = 1024 if M >= 2048 else 512
        Mp = _round_up(M, tm)
    else:                                     # tiny-M deep layers: pad to bf16 sublane pack
        Mp = _round_up(M, 16)
        tm = Mp
        # expose >=2 grid steps for v7x's second TensorCore when possible
        if Np // tn == 1 and Mp % 32 == 0:
            tm = Mp // 2

    has_res = residual is not None

    sp = _pad_to(scale.reshape(1, N).astype(jnp.float32), 1, Np)
    bp = _pad_to(bias.reshape(1, N).astype(jnp.float32), 1, Np)

    # double-buffered bf16 x/w blocks + bf16 out block (+ bf16 residual block)
    fullk_bytes = 2 * 2 * (tm * Kp + Kp * tn) + 2 * 2 * tm * tn
    if has_res:
        fullk_bytes += 2 * 2 * tm * tn
    single_k = fullk_bytes <= 14 * 1024 * 1024

    if single_k:
        xp = _pad_to(xb, Mp, Kp)
        wp = _pad_to(wb, Kp, Np)
        in_specs = [
            pl.BlockSpec((tm, Kp), lambda i, j: (i, 0)),
            pl.BlockSpec((Kp, tn), lambda i, j: (0, j)),
            pl.BlockSpec((1, tn), lambda i, j: (0, j)),
            pl.BlockSpec((1, tn), lambda i, j: (0, j)),
        ]
        args = [xp, wp, sp, bp]
        if has_res:
            in_specs.append(pl.BlockSpec((tm, tn), lambda i, j: (i, j)))
            args.append(_pad_to(residual.astype(jnp.bfloat16), Mp, Np))
        out = pl.pallas_call(
            _mm_kernel_single(act, merge_act, has_res),
            out_shape=jax.ShapeDtypeStruct((Mp, Np), jnp.bfloat16),
            grid_spec=pltpu.PrefetchScalarGridSpec(
                num_scalar_prefetch=0,
                grid=(Mp // tm, Np // tn),
                in_specs=in_specs,
                out_specs=pl.BlockSpec((tm, tn), lambda i, j: (i, j)),
            ),
            compiler_params=pltpu.CompilerParams(
                dimension_semantics=("parallel", "parallel"),
                vmem_limit_bytes=VMEM_LIMIT),
        )(*args)
    else:
        tk = 512
        Kp = _round_up(K, tk)
        xp = _pad_to(xb, Mp, Kp)
        wp = _pad_to(wb, Kp, Np)
        in_specs = [
            pl.BlockSpec((tm, tk), lambda i, j, k: (i, k)),
            pl.BlockSpec((tk, tn), lambda i, j, k: (k, j)),
            pl.BlockSpec((1, tn), lambda i, j, k: (0, j)),
            pl.BlockSpec((1, tn), lambda i, j, k: (0, j)),
        ]
        args = [xp, wp, sp, bp]
        if has_res:
            in_specs.append(pl.BlockSpec((tm, tn), lambda i, j, k: (i, j)))
            args.append(_pad_to(residual.astype(jnp.bfloat16), Mp, Np))
        out = pl.pallas_call(
            _mm_kernel_acc(act, merge_act, has_res),
            out_shape=jax.ShapeDtypeStruct((Mp, Np), jnp.bfloat16),
            grid_spec=pltpu.PrefetchScalarGridSpec(
                num_scalar_prefetch=0,
                grid=(Mp // tm, Np // tn, Kp // tk),
                in_specs=in_specs,
                out_specs=pl.BlockSpec((tm, tn), lambda i, j, k: (i, j)),
                scratch_shapes=[pltpu.VMEM((tm, tn), jnp.float32)],
            ),
            compiler_params=pltpu.CompilerParams(
                dimension_semantics=("parallel", "parallel", "arbitrary"),
                vmem_limit_bytes=VMEM_LIMIT),
        )(*args)
    return out[:M, :N]


# --------------------------------------------------------------------------
# Lane-dense 4-way pooling kernel (max / avg), bf16 in/out, f32 in-register
# --------------------------------------------------------------------------
def _pool_kernel(op):
    def kernel(a_ref, b_ref, c_ref, d_ref, o_ref):
        a = a_ref[...].astype(jnp.float32)
        b = b_ref[...].astype(jnp.float32)
        c = c_ref[...].astype(jnp.float32)
        d = d_ref[...].astype(jnp.float32)
        if op == "max4":
            y = jnp.maximum(jnp.maximum(a, b), jnp.maximum(c, d))
        else:                                   # avg4
            y = (a + b + c + d) * 0.25
        o_ref[...] = y.astype(o_ref.dtype)
    return kernel


@functools.partial(jax.jit, static_argnums=(0,))
def _pool4(op, a, b, c, d):
    shape = a.shape
    T = 1
    for dim in shape:
        T *= dim
    L = 512                                     # lane-dense last dim
    rows = -(-T // L)
    rows16 = _round_up(rows, 16)
    if rows16 >= 32:
        R = min(512, _round_up(rows16 // 2, 16))   # >=2 grid steps (v7x megacore)
    else:
        R = rows16
    rows_p = _round_up(rows16, R)
    Tp = rows_p * L

    def prep(t):
        t = t.reshape(-1).astype(jnp.bfloat16)
        if Tp != T:
            t = jnp.pad(t, (0, Tp - T))
        return t.reshape(rows_p, L)

    flats = [prep(t) for t in (a, b, c, d)]
    out = pl.pallas_call(
        _pool_kernel(op),
        out_shape=jax.ShapeDtypeStruct((rows_p, L), jnp.bfloat16),
        grid=(rows_p // R,),
        in_specs=[pl.BlockSpec((R, L), lambda i: (i, 0)) for _ in range(4)],
        out_specs=pl.BlockSpec((R, L), lambda i: (i, 0)),
        compiler_params=pltpu.CompilerParams(
            dimension_semantics=("parallel",),
            vmem_limit_bytes=VMEM_LIMIT),
    )(*flats)
    return out.reshape(-1)[:T].reshape(shape)


@jax.jit
def maxpool2(x):
    # NHWC 2x2 max pooling, stride 2 (strided slices fuse with the kernel under jit)
    return _pool4("max4",
                  x[:, 0::2, 0::2, :], x[:, 0::2, 1::2, :],
                  x[:, 1::2, 0::2, :], x[:, 1::2, 1::2, :])


@jax.jit
def blur_pool(x):
    # fastai blur: ReplicationPad2d((1,0,1,0)) then AvgPool2d(2, stride=1), NHWC
    N, H, W, C = x.shape
    xp = jnp.pad(x, ((0, 0), (1, 0), (1, 0), (0, 0)), mode="edge")
    return _pool4("avg4",
                  xp[:, 0:H, 0:W, :], xp[:, 0:H, 1:W + 1, :],
                  xp[:, 1:H + 1, 0:W, :], xp[:, 1:H + 1, 1:W + 1, :])


# --------------------------------------------------------------------------
# Conv / linear wrappers (NHWC) built on the Pallas GEMM kernel
# --------------------------------------------------------------------------
def _im2col_nhwc(x, k, stride, pad):
    # Channel-last im2col: no transposes; K ordering is (kh, kw, Cin).
    N, H, W, C = x.shape
    if pad:
        x = jnp.pad(x, ((0, 0), (pad, pad), (pad, pad), (0, 0)))
    Ho = (H + 2 * pad - k) // stride + 1
    Wo = (W + 2 * pad - k) // stride + 1
    cols = []
    for i in range(k):
        for j in range(k):
            cols.append(x[:, i:i + stride * (Ho - 1) + 1:stride,
                            j:j + stride * (Wo - 1) + 1:stride, :])
    col = jnp.concatenate(cols, axis=-1)               # (N, Ho, Wo, k*k*C)
    return col.reshape(N * Ho * Wo, k * k * C), Ho, Wo


@functools.partial(jax.jit, static_argnames=("k", "stride", "pad", "act", "merge_act"))
def conv2d_fused(x, wm, scale, bias, residual=None, *,
                 k=1, stride=1, pad=0, act="none", merge_act="none"):
    # x: NHWC bf16.  wm: (k*k*Cin, Cout) bf16 with (kh, kw, Cin) K ordering.
    N, H, W, Cin = x.shape
    Cout = wm.shape[1]
    if k == 1 and stride == 1 and pad == 0:
        col, Ho, Wo = x.reshape(N * H * W, Cin), H, W
    else:
        # TODO(synk): im2col is still materialized in HBM (bf16, NHWC, no transposes);
        # full in-kernel window gathering via halo DMAs is left for a later pass.
        col, Ho, Wo = _im2col_nhwc(x, k, stride, pad)
    res2d = None if residual is None else residual.reshape(N * Ho * Wo, Cout)
    out = matmul_fused(col, wm, scale, bias, res2d, act=act, merge_act=merge_act)
    return out.reshape(N, Ho, Wo, Cout)


def pixel_shuffle(x, r=2):
    # NHWC PixelShuffle: out[n, h*r+i, w*r+j, c] = in[n, h, w, c*r*r + i*r + j]
    N, H, W, C = x.shape
    c = C // (r * r)
    x = x.reshape(N, H, W, c, r, r)
    x = x.transpose(0, 1, 4, 2, 5, 3)
    return x.reshape(N, H * r, W * r, c)


# --------------------------------------------------------------------------
# Deterministic parameter construction
# --------------------------------------------------------------------------
class ParamGen:
    def __init__(self, seed=0):
        self.key = jax.random.PRNGKey(seed)

    def normal(self, shape, scale):
        self.key, sub = jax.random.split(self.key)
        return jax.random.normal(sub, shape, jnp.float32) * scale


def _conv_weight_matrix(w):
    # (Cout, Cin, kh, kw) -> (kh*kw*Cin, Cout) bf16, matching _im2col_nhwc ordering
    cout = w.shape[0]
    return jnp.transpose(w, (2, 3, 1, 0)).reshape(-1, cout).astype(jnp.bfloat16)


def make_conv_bn(pg, cin, cout, k, stride, pad, act):
    # TODO(synk): fastai conv_layer order is conv->act->bn; conv->bn->act is used here.
    w = pg.normal((cout, cin, k, k), (2.0 / (cin * k * k)) ** 0.5)
    gamma = 1.0 + pg.normal((cout,), 0.05)
    beta = pg.normal((cout,), 0.05)
    # eval-mode BatchNorm with running_mean=0, running_var=1 folded into epilogue
    bn_scale = gamma / jnp.sqrt(1.0 + BN_EPS)
    bn_bias = beta
    wm = _conv_weight_matrix(w)

    def apply(x, residual=None, merge_act="none"):
        return conv2d_fused(x, wm, bn_scale, bn_bias, residual,
                            k=k, stride=stride, pad=pad, act=act, merge_act=merge_act)
    return apply


def make_conv_bias(pg, cin, cout, k, stride, pad, act):
    w = pg.normal((cout, cin, k, k), (2.0 / (cin * k * k)) ** 0.5)
    b = pg.normal((cout,), 0.05)
    ones = jnp.ones((cout,), jnp.float32)
    wm = _conv_weight_matrix(w)

    def apply(x, residual=None, merge_act="none"):
        return conv2d_fused(x, wm, ones, b, residual,
                            k=k, stride=stride, pad=pad, act=act, merge_act=merge_act)
    return apply


def make_bn1d_params(pg, n):
    gamma = 1.0 + pg.normal((n,), 0.05)
    beta = pg.normal((n,), 0.05)
    scale = gamma / jnp.sqrt(1.0 + BN_EPS)    # eval-mode: running_mean=0, running_var=1
    shift = beta
    return scale, shift


def make_linear_bnfold(pg, nin, nout, bn_scale, bn_shift, act="none"):
    # Linear(BN1d(x)) == x @ (W^T * s) + (shift @ W^T + b): BN folded into the GEMM.
    w = pg.normal((nout, nin), (1.0 / nin) ** 0.5)    # PyTorch Linear weight (out, in)
    b = pg.normal((nout,), 0.05)
    wt = (w.T * bn_scale[:, None]).astype(jnp.bfloat16)   # (nin, nout)
    b_eff = b + bn_shift @ w.T                             # (nout,)
    ones = jnp.ones((nout,), jnp.float32)

    def apply(x2d):
        return matmul_fused(x2d, wt, ones, b_eff, act=act)
    return apply


def make_resblock(pg, nf, merge_act="none"):
    # fastai res_block: conv_layer(nf,nf) -> conv_layer(nf,nf) -> residual add.
    # The residual add (+ merge activation) is fused into the 2nd conv's epilogue.
    c1 = make_conv_bn(pg, nf, nf, 3, 1, 1, "relu")
    c2 = make_conv_bn(pg, nf, nf, 3, 1, 1, "relu")

    def apply(x):
        return c2(c1(x), residual=x, merge_act=merge_act)
    return apply


def make_pixel_shuffle_icnr(pg, ni, nf=None, do_blur=False):
    # fastai PixelShuffle_ICNR: 1x1 conv ni -> nf*4 (bias), LeakyReLU(0.1),
    # PixelShuffle(2), optional replication-pad + 2x2 stride-1 avg blur.
    nf = ni if nf is None else nf
    conv = make_conv_bias(pg, ni, nf * 4, 1, 1, 0, "leaky")

    def apply(x):
        y = pixel_shuffle(conv(x), 2)
        return blur_pool(y) if do_blur else y
    return apply


def make_nice_downscale(pg, cin, cout, k=4, activation=True):
    # TODO(synk): NiceDownscale is not defined in the reference source; assumed
    # stride-2 conv (pad=k//2-1) + BatchNorm (+ ReLU when activation=True).
    return make_conv_bn(pg, cin, cout, k, 2, k // 2 - 1,
                        "relu" if activation else "none")


def make_concat_downscale(pg, cin, cout):
    # TODO(synk): concat_downscale is not defined in the reference source; assumed
    # concat([stride-2 conv (cin -> cout-cin) + BN + ReLU, 2x2 max-pool(x)]).
    conv = make_conv_bn(pg, cin, cout - cin, 3, 2, 1, "relu")

    def apply(x):
        return jnp.concatenate([conv(x), maxpool2(x)], axis=-1)
    return apply


# --------------------------------------------------------------------------
# Encoder / Decoder / AutoEncoder (internal layout NHWC, bf16 activations)
# --------------------------------------------------------------------------
def make_encoder(pg, c_out):
    nd1 = make_nice_downscale(pg, 3, 32, k=6, activation=False)
    cd1 = make_concat_downscale(pg, 32, 64)
    rb1 = make_resblock(pg, 64)
    cd2 = make_concat_downscale(pg, 64, 128)
    rb2 = make_resblock(pg, 128)
    cd3 = make_concat_downscale(pg, 128, 256)
    rb3 = make_resblock(pg, 256)
    nd2 = make_nice_downscale(pg, 256, 512, k=4)
    rb4 = make_resblock(pg, 512)
    nd3 = make_nice_downscale(pg, 512, 1024, k=4)
    # Flatten -> ReLU -> BatchNorm1d(1024) -> Linear(1024, c_out) -> Tanh:
    # nd3's epilogue already applies ReLU (standalone ReLU is idempotent here);
    # BN1d is folded into the Linear weights (one GEMM, tanh in the epilogue).
    bn_s, bn_t = make_bn1d_params(pg, 1024)
    lin = make_linear_bnfold(pg, 1024, c_out, bn_s, bn_t, act="tanh")

    def apply(x):                        # x: NHWC bf16
        x = nd1(x)                       # 64x64x32
        x = maxpool2(x)                  # 32x32x32
        x = rb1(cd1(x))                  # 16x16x64
        x = rb2(cd2(x))                  # 8x8x128
        x = rb3(cd3(x))                  # 4x4x256
        x = rb4(nd2(x))                  # 2x2x512
        x = nd3(x)                       # 1x1x1024  (ReLU already applied)
        z = x.reshape(x.shape[0], -1)    # Flatten
        return lin(z)                    # BN1d-folded Linear + Tanh
    return apply


def make_decoder(pg, c_in):
    # BatchNorm1d(c_in) -> Linear(c_in, 1024): BN folded into the Linear GEMM.
    bn_s, bn_t = make_bn1d_params(pg, c_in)
    lin = make_linear_bnfold(pg, c_in, 1024, bn_s, bn_t, act="none")
    ps1 = make_pixel_shuffle_icnr(pg, 256)
    rb1 = make_resblock(pg, 256)
    cb1 = make_conv_bn(pg, 256, 512, 1, 1, 0, "relu")
    ps2 = make_pixel_shuffle_icnr(pg, 512, 256)
    rb2 = make_resblock(pg, 256)
    cb2 = make_conv_bn(pg, 256, 512, 1, 1, 0, "relu")
    ps3 = make_pixel_shuffle_icnr(pg, 512, 256)
    rb3 = make_resblock(pg, 256)
    ps4 = make_pixel_shuffle_icnr(pg, 256, 128)
    rb4 = make_resblock(pg, 128)
    ps5 = make_pixel_shuffle_icnr(pg, 128, 64, do_blur=True)
    rb5 = make_resblock(pg, 64)
    ps6 = make_pixel_shuffle_icnr(pg, 64, 32, do_blur=True)
    cb3 = make_conv_bn(pg, 32, 3, 1, 1, 0, "relu")
    rb6 = make_resblock(pg, 3, merge_act="sigmoid")   # final nn.Sigmoid fused in merge

    def apply(z):
        bs = z.shape[0]
        x = lin(z)                                         # (bs, 1024)
        # Restructure: NCHW view (bs,256,2,2) -> NHWC (bs,2,2,256)
        x = x.reshape(bs, 256, 2, 2).transpose(0, 2, 3, 1)
        x = rb1(ps1(x))                   # 4x4x256
        x = cb1(x)                        # 4x4x512
        x = rb2(ps2(x))                   # 8x8x256
        x = cb2(x)                        # 8x8x512
        x = rb3(ps3(x))                   # 16x16x256
        x = rb4(ps4(x))                   # 32x32x128
        x = rb5(ps5(x))                   # 64x64x64
        x = ps6(x)                        # 128x128x32
        x = cb3(x)                        # 128x128x3
        return rb6(x)                     # ResBlock(3) + Sigmoid (fused)
    return apply


def make_autoencoder(nf, seed=0):
    pg = ParamGen(seed)
    enc = make_encoder(pg, nf)
    dec = make_decoder(pg, nf)

    def forward(x_nchw):
        # single layout transpose in / out; bf16 activations inside
        x = jnp.transpose(x_nchw, (0, 2, 3, 1)).astype(jnp.bfloat16)
        z = enc(x)
        # eval-mode forward: training-mode Gaussian noise (z + randn*0.05) is skipped
        y = dec(z)                                          # NHWC bf16
        return jnp.transpose(y, (0, 3, 1, 2)).astype(jnp.float32)
    return forward


# --------------------------------------------------------------------------
if __name__ == "__main__":
    nf = 32                                   # latent size
    key = jax.random.PRNGKey(0)
    # spatial size 128 is fixed by the architecture (7 stride-2 stages -> 1x1 before Flatten)
    x = jax.random.uniform(key, (1, 3, 128, 128), jnp.float32)

    model = make_autoencoder(nf, seed=0)
    y = model(x)
    y = jax.block_until_ready(y)
    assert y.shape == (1, 3, 128, 128), y.shape
    print("KERNEL_OK")
</pallas_src>

<mosaic_0001>
module attributes {stable_mosaic.version = 11 : i64} {
  func.func @kernel(%arg0: i32, %arg1: i32, %arg2: memref<1024x128xbf16, #tpu.memory_space<vmem>>, %arg3: memref<128x128xbf16, #tpu.memory_space<vmem>>, %arg4: memref<1x128xf32, #tpu.memory_space<vmem>>, %arg5: memref<1x128xf32, #tpu.memory_space<vmem>>, %arg6: memref<1024x128xbf16, #tpu.memory_space<vmem>>) attributes {dimension_semantics = [#tpu.dimension_semantics<parallel>, #tpu.dimension_semantics<parallel>], iteration_bounds = array<i64: 4, 1>, scalar_prefetch = 0 : i64, scratch_operands = 0 : i64, tpu.core_type = #tpu.core_type<tc>, window_params = [{transform_indices = @transform_0, window_bounds = array<i64: 1024, 128>}, {transform_indices = @transform_1, window_bounds = array<i64: 128, 128>}, {transform_indices = @transform_2, window_bounds = array<i64: 1, 128>}, {transform_indices = @transform_3, window_bounds = array<i64: 1, 128>}, {transform_indices = @transform_4, window_bounds = array<i64: 1024, 128>}]} {
    %c0 = arith.constant 0 : index
    %c0_0 = arith.constant 0 : index
    %0 = vector.load %arg2[%c0, %c0_0] : memref<1024x128xbf16, #tpu.memory_space<vmem>>, vector<1024x128xbf16>
    %c0_1 = arith.constant 0 : index
    %c0_2 = arith.constant 0 : index
    %1 = vector.load %arg3[%c0_1, %c0_2] : memref<128x128xbf16, #tpu.memory_space<vmem>>, vector<128x128xbf16>
    %cst = arith.constant dense<0.000000e+00> : vector<1024x128xf32>
    %2 = tpu.matmul %0, %1, %cst {dimension_numbers = #tpu.dot_dimension_numbers<[1], [0], [0], [1], [0, 0, 1, 1], [], []>} : vector<1024x128xbf16>, vector<128x128xbf16>, vector<1024x128xf32> -> vector<1024x128xf32>
    %c0_3 = arith.constant 0 : index
    %c0_4 = arith.constant 0 : index
    %3 = vector.load %arg4[%c0_3, %c0_4] : memref<1x128xf32, #tpu.memory_space<vmem>>, vector<1x128xf32>
    %4 = vector.broadcast %3 : vector<1x128xf32> to vector<1024x128xf32>
    %5 = arith.mulf %2, %4 : vector<1024x128xf32>
    %c0_5 = arith.constant 0 : index
    %c0_6 = arith.constant 0 : index
    %6 = vector.load %arg5[%c0_5, %c0_6] : memref<1x128xf32, #tpu.memory_space<vmem>>, vector<1x128xf32>
    %7 = vector.broadcast %6 : vector<1x128xf32> to vector<1024x128xf32>
    %8 = arith.addf %5, %7 : vector<1024x128xf32>
    %9 = arith.truncf %8 : vector<1024x128xf32> to vector<1024x128xbf16>
    %c0_7 = arith.constant 0 : index
    %c0_8 = arith.constant 0 : index
    %10 = vector.load %arg6[%c0_7, %c0_8] : memref<1024x128xbf16, #tpu.memory_space<vmem>>, vector<1024x128xbf16>
    tpu.vector_store %arg6[%c0_7, %c0_8], %9 {strides = array<i32>} : memref<1024x128xbf16, #tpu.memory_space<vmem>>, vector<1024x128xbf16>,
    return
  }
  func.func @transform_0(%arg0: i32, %arg1: i32) -> (i32, i32) {
    %c0_i32 = arith.constant 0 : i32
    %c0_i32_0 = arith.constant 0 : i32
    return %arg0, %c0_i32 : i32, i32
  }
  func.func @transform_1(%arg0: i32, %arg1: i32) -> (i32, i32) {
    %c0_i32 = arith.constant 0 : i32
    %c0_i32_0 = arith.constant 0 : i32
    return %c0_i32, %arg1 : i32, i32
  }
  func.func @transform_2(%arg0: i32, %arg1: i32) -> (i32, i32) {
    %c0_i32 = arith.constant 0 : i32
    %c0_i32_0 = arith.constant 0 : i32
    return %c0_i32, %arg1 : i32, i32
  }
  func.func @transform_3(%arg0: i32, %arg1: i32) -> (i32, i32) {
    %c0_i32 = arith.constant 0 : i32
    %c0_i32_0 = arith.constant 0 : i32
    return %c0_i32, %arg1 : i32, i32
  }
  func.func @transform_4(%arg0: i32, %arg1: i32) -> (i32, i32) {
    %c0_i32 = arith.constant 0 : i32
    return %arg0, %arg1 : i32, i32
  }
}

</mosaic_0001>

<bundles_post_ra>
// kernel: matmul_fused.1
= control target key start
LH: loop header
LB: loop body
LE: loop exit
PB: predicated region body
PF: predicated region fallthrough
CT: control target
= control target key end

     0   :  { %s3516_s15 = smov 0   ;;  %s3518_s16 = smov 0   ;;  %s3978_s0 = inlined_call_operand.vmem [shape: bf16[4096,128], index: 0, kind: input, shape index: {}]   ;;  %s3979_s1 = inlined_call_operand.vmem [shape: bf16[128,128], index: 1, kind: input, shape index: {}]   ;;  %s3980_s2 = inlined_call_operand.vmem [shape: f32[1,128], index: 2, kind: input, shape index: {}]   ;;  %s3981_s3 = inlined_call_operand.vmem [shape: f32[1,128], index: 3, kind: input, shape index: {}]   ;;  %s3982_s4 = inlined_call_operand.vmem [shape: bf16[4096,128], index: 4, kind: output, shape index: {}]  }
   0x1   :  { %s3520_s17 = smov 0  }
   0x2 LB: > { %s26_s18 = sadd.s32 1, %s3485_s16  ;;  %p2419_p0 = scmp.ge.s32.totalorder %s3489_s17, 1  ;;  %s3489_s17 = sphi %s3520_s17, %s14_s17   ;;  %s3485_s16 = sphi %s3518_s16, %s3984_s16   ;;  %s3481_s15 = sphi %s3516_s15, %s3983_s15  }
   0x3   : > { %p28_p1 = scmp.ge.s32.totalorder %s26_s18, 4  ;;  %p202_p2 = scmp.lt.s32.totalorder %s3489_s17, 5 }
   0x5   : > { %s3986_s18 = smov (%p28_p1, %s26_s18), 0  ;;  %p203_p3 = pnand %p2419_p0, %p202_p2 }
   0x6   : > { %s2420_s21 = sshll.u32 (!%p203_p3), %s3481_s15, 7 }
   0x7   : > { %206 = sbr.rel (%p203_p3) target bundleno = 371 (0x173), region = 36  ;;  %p242_p4 = scmp.lt.s32.totalorder (!%p203_p3), %s2420_s21, 511 }
   0xc   : > { %v3395_v0 = vld [vmem:[%s3979_s1 + $0x38] sm:$0xff]   ;;  %v3396_v1 = vld [vmem:[%s3979_s1 + $0x30] sm:$0xff]   ;;  %s3988_s21 = smov (!%p242_p4, %s2420_s21), 511  ;;  %v3397_v2 = vld [vmem:[%s3979_s1 + $0x28] sm:$0xff]  }
   0xd   : > { %3211 = vmatprep.subr.bf16.mxu0 %v3395_v0  ;;  %3355 = vmatprep.subr.bf16.mxu1 %v3395_v0  ;;  %s2421_s26 = sshll.u32 %s3988_s21, 2  ;;  %v3398_v3 = vld [vmem:[%s3979_s1 + $0x20] sm:$0xff]   ;;  %v3399_v6 = vld [vmem:[%s3979_s1 + $0x18] sm:$0xff]   ;;  %v3400_v7 = vld [vmem:[%s3979_s1 + $0x10] sm:$0xff]  }
   0xe   : > { %3212 = vmatpush3.bf16.msra.mxu0 %v3395_v0  ;;  %3363 = vmatpush3.bf16.msra.mxu1 %v3395_v0  ;;  %s3551_s29 = scalar_lea.vmem %s3978_s0, %s2421_s26  ;;  %v3401_v8 = vld [vmem:[%s3979_s1 + $0x8] sm:$0xff]   ;;  %v3402_v9 = vld [vmem:[%s3979_s1] sm:$0xff]   ;;  %s3661_s24 = scalar_lea.vmem %s3982_s4, %s2421_s26 }
   0xf   : > { %3213 = vmatprep.subr.bf16.mxu0 %v3396_v1  ;;  %3356 = vmatprep.subr.bf16.mxu1 %v3396_v1  ;;  %v3403_v4 = vld [vmem:[%s3551_s29] sm:$0xff]   ;;  %v3405_v10 = vld [vmem:[%s3551_s29 + $0x8] sm:$0xff]   ;;  %v3407_v12 = vld [vmem:[%s3551_s29 + $0x10] sm:$0xff]  }
  0x10   : > { %v3404_v5 = vld [vmem:[%s3551_s29 + $0x100] sm:$0xff]   ;;  %3227 = vmatprep.mubr.bf16.mxu0 %v3403_v4  ;;  %v3406_v11 = vld [vmem:[%s3551_s29 + $0x108] sm:$0xff]   ;;  %v3408_v13 = vld [vmem:[%s3551_s29 + $0x110] sm:$0xff]  }
  0x11   : > { %3291 = vmatprep.mubr.bf16.mxu1 %v3404_v5  ;;  %v3409_v14 = vld [vmem:[%s3551_s29 + $0x18] sm:$0xff]   ;;  %v3411_v16 = vld [vmem:[%s3551_s29 + $0x20] sm:$0xff]   ;;  %v3413_v18 = vld [vmem:[%s3551_s29 + $0x28] sm:$0xff]  }
  0x12   : > { %3214 = vmatpush3.bf16.msra.mxu0 %v3396_v1  ;;  %3364 = vmatpush3.bf16.msra.mxu1 %v3396_v1  ;;  %v3410_v15 = vld [vmem:[%s3551_s29 + $0x118] sm:$0xff]   ;;  %v3412_v17 = vld [vmem:[%s3551_s29 + $0x120] sm:$0xff]   ;;  %v3414_v19 = vld [vmem:[%s3551_s29 + $0x128] sm:$0xff]  }
  0x13   : > { %3215 = vmatprep.subr.bf16.mxu0 %v3397_v2  ;;  %3357 = vmatprep.subr.bf16.mxu1 %v3397_v2  ;;  %v3415_v20 = vld [vmem:[%s3551_s29 + $0x30] sm:$0xff]   ;;  %v3417_v22 = vld [vmem:[%s3551_s29 + $0x38] sm:$0xff]   ;;  %v3419_v24 = vld [vmem:[%s3551_s29 + $0x40] sm:$0xff]  }
  0x14   : > { %v3416_v21 = vld [vmem:[%s3551_s29 + $0x130] sm:$0xff]   ;;  %v3418_v23 = vld [vmem:[%s3551_s29 + $0x138] sm:$0xff]   ;;  %v3420_v25 = vld [vmem:[%s3551_s29 + $0x140] sm:$0xff]  }
  0x15   : > { %v3421_v26 = vld [vmem:[%s3551_s29 + $0x48] sm:$0xff]   ;;  %v3423_v28 = vld [vmem:[%s3551_s29 + $0x50] sm:$0xff]   ;;  %v3425_v30 = vld [vmem:[%s3551_s29 + $0x58] sm:$0xff]  }
  0x16   : > { %3216 = vmatpush3.bf16.msra.mxu0 %v3397_v2  ;;  %3365 = vmatpush3.bf16.msra.mxu1 %v3397_v2  ;;  %v3422_v27 = vld [vmem:[%s3551_s29 + $0x148] sm:$0xff]   ;;  %v3424_v29 = vld [vmem:[%s3551_s29 + $0x150] sm:$0xff]   ;;  %v3426_v31 = vld [vmem:[%s3551_s29 + $0x158] sm:$0xff]  }
  0x17   : > { %3217 = vmatprep.subr.bf16.mxu0 %v3398_v3  ;;  %3358 = vmatprep.subr.bf16.mxu1 %v3398_v3  ;;  %v3427_v32 = vld [vmem:[%s3551_s29 + $0x60] sm:$0xff]   ;;  %v3429_v34 = vld [vmem:[%s3551_s29 + $0x68] sm:$0xff]   ;;  %v3431_v36 = vld [vmem:[%s3551_s29 + $0x70] sm:$0xff]  }
  0x18   : > { %v3428_v33 = vld [vmem:[%s3551_s29 + $0x160] sm:$0xff]   ;;  %v3430_v35 = vld [vmem:[%s3551_s29 + $0x168] sm:$0xff]   ;;  %v3432_v37 = vld [vmem:[%s3551_s29 + $0x170] sm:$0xff]  }
  0x19   : > { %v3433_v38 = vld [vmem:[%s3551_s29 + $0x78] sm:$0xff]   ;;  %v3435_v40 = vld [vmem:[%s3551_s29 + $0x80] sm:$0xff]   ;;  %v3437_v42 = vld [vmem:[%s3551_s29 + $0x88] sm:$0xff]  }
  0x1a   : > { %3218 = vmatpush3.bf16.msra.mxu0 %v3398_v3  ;;  %3366 = vmatpush3.bf16.msra.mxu1 %v3398_v3  ;;  %v3434_v39 = vld [vmem:[%s3551_s29 + $0x178] sm:$0xff]   ;;  %v3436_v41 = vld [vmem:[%s3551_s29 + $0x180] sm:$0xff]   ;;  %v3438_v43 = vld [vmem:[%s3551_s29 + $0x188] sm:$0xff]  }
  0x1b   : > { %3219 = vmatprep.subr.bf16.mxu0 %v3399_v6  ;;  %3359 = vmatprep.subr.bf16.mxu1 %v3399_v6  ;;  %v3439_v44 = vld [vmem:[%s3551_s29 + $0x90] sm:$0xff]   ;;  %v3441_v46 = vld [vmem:[%s3551_s29 + $0x98] sm:$0xff]   ;;  %v3443_v48 = vld [vmem:[%s3551_s29 + $0xa0] sm:$0xff]  }
  0x1c   : > { %v3440_v45 = vld [vmem:[%s3551_s29 + $0x190] sm:$0xff]   ;;  %v3442_v47 = vld [vmem:[%s3551_s29 + $0x198] sm:$0xff]   ;;  %v3444_v49 = vld [vmem:[%s3551_s29 + $0x1a0] sm:$0xff]  }
  0x1d   : > { %v3445_v50 = vld [vmem:[%s3551_s29 + $0xa8] sm:$0xff]   ;;  %v3447_v52 = vld [vmem:[%s3551_s29 + $0xb0] sm:$0xff]   ;;  %v3449_v54 = vld [vmem:[%s3551_s29 + $0xb8] sm:$0xff]  }
  0x1e   : > { %3220 = vmatpush3.bf16.msra.mxu0 %v3399_v6  ;;  %3367 = vmatpush3.bf16.msra.mxu1 %v3399_v6  ;;  %v3446_v51 = vld [vmem:[%s3551_s29 + $0x1a8] sm:$0xff]   ;;  %v3448_v53 = vld [vmem:[%s3551_s29 + $0x1b0] sm:$0xff]   ;;  %v3450_v55 = vld [vmem:[%s3551_s29 + $0x1b8] sm:$0xff]  }
  0x1f   : > { %3221 = vmatprep.subr.bf16.mxu0 %v3400_v7  ;;  %3360 = vmatprep.subr.bf16.mxu1 %v3400_v7  ;;  %v3451_v56 = vld [vmem:[%s3551_s29 + $0xc0] sm:$0xff]   ;;  %v3453_v58 = vld [vmem:[%s3551_s29 + $0xc8] sm:$0xff]   ;;  %v3455_v60 = vld [vmem:[%s3551_s29 + $0xd0] sm:$0xff]  }
  0x20   : > { %v3452_v57 = vld [vmem:[%s3551_s29 + $0x1c0] sm:$0xff]   ;;  %v3454_v59 = vld [vmem:[%s3551_s29 + $0x1c8] sm:$0xff]   ;;  %v3456_v61 = vld [vmem:[%s3551_s29 + $0x1d0] sm:$0xff]  }
  0x21   : > { %v3457_v62 = vld [vmem:[%s3551_s29 + $0xd8] sm:$0xff]   ;;  %v3459_v0 = vld [vmem:[%s3551_s29 + $0xe0] sm:$0xff]   ;;  %v3461_v2 = vld [vmem:[%s3551_s29 + $0xe8] sm:$0xff]  }
  0x22   : > { %3222 = vmatpush3.bf16.msra.mxu0 %v3400_v7  ;;  %3368 = vmatpush3.bf16.msra.mxu1 %v3400_v7  ;;  %v3458_v63 = vld [vmem:[%s3551_s29 + $0x1d8] sm:$0xff]   ;;  %v3460_v1 = vld [vmem:[%s3551_s29 + $0x1e0] sm:$0xff]   ;;  %v3462_v3 = vld [vmem:[%s3551_s29 + $0x1e8] sm:$0xff]  }
  0x23   : > { %3223 = vmatprep.subr.bf16.mxu0 %v3401_v8  ;;  %3361 = vmatprep.subr.bf16.mxu1 %v3401_v8  ;;  %v3463_v4 = vld [vmem:[%s3551_s29 + $0xf0] sm:$0xff]   ;;  %v3465_v6 = vld [vmem:[%s3551_s29 + $0xf8] sm:$0xff]  }
  0x24   : > { %v3464_v5 = vld [vmem:[%s3551_s29 + $0x1f0] sm:$0xff]   ;;  %v3466_v7 = vld [vmem:[%s3551_s29 + $0x1f8] sm:$0xff]  }
  0x26   : > { %3224 = vmatpush3.bf16.msra.mxu0 %v3401_v8  ;;  %3369 = vmatpush3.bf16.msra.mxu1 %v3401_v8  ;;  %v3635_v8 = vld [vmem:[%s3980_s2] ss:$0 sm:$0xff] }
  0x27   : > { %3225 = vmatprep.subr.bf16.mxu0 %v3402_v9  ;;  %3362 = vmatprep.subr.bf16.mxu1 %v3402_v9 }
  0x2a   : > { %3226 = vmatpush3.bf16.msra.mxu0 %v3402_v9  ;;  %3370 = vmatpush3.bf16.msra.mxu1 %v3402_v9 }
  0x2d   : > { %3228 = vmatmul.mubr.bf16.vlgmr.msra.gmra.mxu0 %v3405_v10  ;;  %3292 = vmatmul.mubr.bf16.vlgmr.msra.gmra.mxu1 %v3406_v11 }
  0x2e   : > { %3231 = vmatprep.mubr.bf16.mxu0 %v3407_v12  ;;  %3295 = vmatprep.mubr.bf16.mxu1 %v3408_v13 }
  0x35   : > { %3232 = vmatmul.mubr.bf16.gmra.mxu0 %v3409_v14  ;;  %3296 = vmatmul.mubr.bf16.gmra.mxu1 %v3410_v15  ;;  %v3642_v15 = vld [vmem:[%s3981_s3] ss:$0 sm:$0xff] }
  0x36   : > { %3235 = vmatprep.mubr.bf16.mxu0 %v3411_v16  ;;  %3299 = vmatprep.mubr.bf16.mxu1 %v3412_v17 }
  0x3d   : > { %3236 = vmatmul.mubr.bf16.gmra.mxu0 %v3413_v18  ;;  %3300 = vmatmul.mubr.bf16.gmra.mxu1 %v3414_v19 }
  0x3e   : > { %3239 = vmatprep.mubr.bf16.mxu0 %v3415_v20  ;;  %3303 = vmatprep.mubr.bf16.mxu1 %v3416_v21 }
  0x45   : > { %3240 = vmatmul.mubr.bf16.gmra.mxu0 %v3417_v22  ;;  %3304 = vmatmul.mubr.bf16.gmra.mxu1 %v3418_v23 }
  0x46   : > { %3243 = vmatprep.mubr.bf16.mxu0 %v3419_v24  ;;  %3307 = vmatprep.mubr.bf16.mxu1 %v3420_v25 }
  0x4d   : > { %3244 = vmatmul.mubr.bf16.gmra.mxu0 %v3421_v26  ;;  %3308 = vmatmul.mubr.bf16.gmra.mxu1 %v3422_v27 }
  0x4e   : > { %3247 = vmatprep.mubr.bf16.mxu0 %v3423_v28  ;;  %3311 = vmatprep.mubr.bf16.mxu1 %v3424_v29 }
  0x55   : > { %3248 = vmatmul.mubr.bf16.gmra.mxu0 %v3425_v30  ;;  %3312 = vmatmul.mubr.bf16.gmra.mxu1 %v3426_v31 }
  0x56   : > { %3251 = vmatprep.mubr.bf16.mxu0 %v3427_v32  ;;  %3315 = vmatprep.mubr.bf16.mxu1 %v3428_v33 }
  0x5d   : > { %3252 = vmatmul.mubr.bf16.gmra.mxu0 %v3429_v34  ;;  %3316 = vmatmul.mubr.bf16.gmra.mxu1 %v3430_v35 }
  0x5e   : > { %3255 = vmatprep.mubr.bf16.mxu0 %v3431_v36  ;;  %3319 = vmatprep.mubr.bf16.mxu1 %v3432_v37 }
  0x65   : > { %3256 = vmatmul.mubr.bf16.gmra.mxu0 %v3433_v38  ;;  %3320 = vmatmul.mubr.bf16.gmra.mxu1 %v3434_v39 }
  0x66   : > { %3259 = vmatprep.mubr.bf16.mxu0 %v3435_v40  ;;  %3323 = vmatprep.mubr.bf16.mxu1 %v3436_v41 }
  0x6d   : > { %3260 = vmatmul.mubr.bf16.gmra.mxu0 %v3437_v42  ;;  %3324 = vmatmul.mubr.bf16.gmra.mxu1 %v3438_v43 }
  0x6e   : > { %3263 = vmatprep.mubr.bf16.mxu0 %v3439_v44  ;;  %3327 = vmatprep.mubr.bf16.mxu1 %v3440_v45 }
  0x75   : > { %3264 = vmatmul.mubr.bf16.gmra.mxu0 %v3441_v46  ;;  %3328 = vmatmul.mubr.bf16.gmra.mxu1 %v3442_v47 }
  0x76   : > { %3267 = vmatprep.mubr.bf16.mxu0 %v3443_v48  ;;  %3331 = vmatprep.mubr.bf16.mxu1 %v3444_v49 }
  0x7d   : > { %3268 = vmatmul.mubr.bf16.gmra.mxu0 %v3445_v50  ;;  %3332 = vmatmul.mubr.bf16.gmra.mxu1 %v3446_v51 }
  0x7e   : > { %3271 = vmatprep.mubr.bf16.mxu0 %v3447_v52  ;;  %3335 = vmatprep.mubr.bf16.mxu1 %v3448_v53 }
  0x85   : > { %3272 = vmatmul.mubr.bf16.gmra.mxu0 %v3449_v54  ;;  %3336 = vmatmul.mubr.bf16.gmra.mxu1 %v3450_v55 }
  0x86   : > { %3275 = vmatprep.mubr.bf16.mxu0 %v3451_v56  ;;  %3339 = vmatprep.mubr.bf16.mxu1 %v3452_v57 }
  0x8d   : > { %3276 = vmatmul.mubr.bf16.gmra.mxu0 %v3453_v58  ;;  %3340 = vmatmul.mubr.bf16.gmra.mxu1 %v3454_v59 }
  0x8e   : > { %3279 = vmatprep.mubr.bf16.mxu0 %v3455_v60  ;;  %3343 = vmatprep.mubr.bf16.mxu1 %v3456_v61 }
  0x95   : > { %3280 = vmatmul.mubr.bf16.gmra.mxu0 %v3457_v62  ;;  %3344 = vmatmul.mubr.bf16.gmra.mxu1 %v3458_v63 }
  0x96   : > { %3283 = vmatprep.mubr.bf16.mxu0 %v3459_v0  ;;  %3347 = vmatprep.mubr.bf16.mxu1 %v3460_v1 }
  0x9d   : > { %3284 = vmatmul.mubr.bf16.gmra.mxu0 %v3461_v2  ;;  %3348 = vmatmul.mubr.bf16.gmra.mxu1 %v3462_v3 }
  0x9e   : > { %3287 = vmatprep.mubr.bf16.mxu0 %v3463_v4  ;;  %3351 = vmatprep.mubr.bf16.mxu1 %v3464_v5 }
  0xa5   : > { %3288 = vmatmul.mubr.bf16.gmra.mxu0 %v3465_v6  ;;  %3352 = vmatmul.mubr.bf16.gmra.mxu1 %v3466_v7 }
  0xed   : > { %v3229_v9 = vpop.f32.mrf.mxu0  ;;  %v3293_v10 = vpop.f32.mrf.mxu1 }
  0xee   : > { %v1397_v11 = vmul.f32 %v3229_v9, %v3635_v8  ;;  %v1461_v12 = vmul.f32 %v3293_v10, %v3635_v8 }
  0xef   : > { %v877_v13 = vpop.f32.mrf.mxu0  ;;  %v1133_v14 = vpop.f32.mrf.mxu1 }
  0xf0   : > { %v1395_v16 = vmul.f32 %v3635_v8, %v877_v13  ;;  %v1459_v17 = vmul.f32 %v3635_v8, %v1133_v14  ;;  %v1532_v22 = vadd.f32 %v3642_v15, %v1397_v11  ;;  %v1596_v23 = vadd.f32 %v3642_v15, %v1461_v12 }
  0xf1   : > { %v3230_v18 = vpop.f32.mrf.mxu0  ;;  %v3294_v19 = vpop.f32.mrf.mxu1 }
  0xf2   : > { %v1398_v20 = vmul.f32 %v3230_v18, %v3635_v8  ;;  %v1462_v21 = vmul.f32 %v3294_v19, %v3635_v8  ;;  %v1530_v30 = vadd.f32 %v3642_v15, %v1395_v16  ;;  %v1594_v31 = vadd.f32 %v3642_v15, %v1459_v17 }
  0xf3   : > { %v880_v24 = vpop.f32.mrf.mxu0  ;;  %v1136_v25 = vpop.f32.mrf.mxu1 }
  0xf4   : > { %v1533_v26 = vadd.f32 %v3642_v15, %v1398_v20  ;;  %v1597_v27 = vadd.f32 %v3642_v15, %v1462_v21  ;;  %v1396_v28 = vmul.f32 %v3635_v8, %v880_v24  ;;  %v1460_v29 = vmul.f32 %v3635_v8, %v1136_v25 }
  0xf5   : > { %v3233_v32 = vpop.f32.mrf.mxu0  ;;  %v3297_v33 = vpop.f32.mrf.mxu1 }
  0xf6   : > { %v2764_v34 = vpack.c.bf16 %v1533_v26, %v1532_v22  ;;  %v2924_v35 = vpack.c.bf16 %v1597_v27, %v1596_v23  ;;  %v1531_v36 = vadd.f32 %v3642_v15, %v1396_v28  ;;  %v1595_v37 = vadd.f32 %v3642_v15, %v1460_v29 }
  0xf7   : > { %v1401_v38 = vmul.f32 %v3233_v32, %v3635_v8  ;;  %v1465_v39 = vmul.f32 %v3297_v33, %v3635_v8  ;;  %v893_v40 = vpop.f32.mrf.mxu0  ;;  %v1149_v41 = vpop.f32.mrf.mxu1 }
  0xf8   : > { %3076 = vst [vmem:[%s3661_s24 + $0x8] sm:$0xff] %v2764_v34   ;;  %3108 = vst [vmem:[%s3661_s24 + $0x108] sm:$0xff] %v2924_v35   ;;  %v2759_v42 = vpack.c.bf16 %v1531_v36, %v1530_v30  ;;  %v2919_v43 = vpack.c.bf16 %v1595_v37, %v1594_v31  ;;  %v1399_v44 = vmul.f32 %v3635_v8, %v893_v40 }
  0xf9   : > { %v1463_v45 = vmul.f32 %v3635_v8, %v1149_v41  ;;  %v3234_v46 = vpop.f32.mrf.mxu0  ;;  %v3298_v47 = vpop.f32.mrf.mxu1  ;;  %v1536_v50 = vadd.f32 %v3642_v15, %v1401_v38  ;;  %v1600_v51 = vadd.f32 %v3642_v15, %v1465_v39 }
  0xfa   : > { %2760 = vst [vmem:[%s3661_s24] sm:$0xff] %v2759_v42   ;;  %3107 = vst [vmem:[%s3661_s24 + $0x100] sm:$0xff] %v2919_v43   ;;  %v1402_v48 = vmul.f32 %v3234_v46, %v3635_v8  ;;  %v1466_v49 = vmul.f32 %v3298_v47, %v3635_v8  ;;  %v1534_v58 = vadd.f32 %v3642_v15, %v1399_v44 }
  0xfb   : > { %v896_v52 = vpop.f32.mrf.mxu0  ;;  %v1152_v53 = vpop.f32.mrf.mxu1  ;;  %v1598_v59 = vadd.f32 %v3642_v15, %v1463_v45 }
  0xfc   : > { %v1537_v54 = vadd.f32 %v3642_v15, %v1402_v48  ;;  %v1601_v55 = vadd.f32 %v3642_v15, %v1466_v49  ;;  %v1400_v56 = vmul.f32 %v3635_v8, %v896_v52  ;;  %v1464_v57 = vmul.f32 %v3635_v8, %v1152_v53 }
  0xfd   : > { %v3237_v60 = vpop.f32.mrf.mxu0  ;;  %v3301_v61 = vpop.f32.mrf.mxu1 }
  0xfe   : > { %v2774_v62 = vpack.c.bf16 %v1537_v54, %v1536_v50  ;;  %v2934_v63 = vpack.c.bf16 %v1601_v55, %v1600_v51  ;;  %v1535_v0 = vadd.f32 %v3642_v15, %v1400_v56  ;;  %v1599_v1 = vadd.f32 %v3642_v15, %v1464_v57 }
  0xff   : > { %v1405_v2 = vmul.f32 %v3237_v60, %v3635_v8  ;;  %v1469_v3 = vmul.f32 %v3301_v61, %v3635_v8  ;;  %v909_v4 = vpop.f32.mrf.mxu0  ;;  %v1165_v5 = vpop.f32.mrf.mxu1 }
 0x100   : > { %3078 = vst [vmem:[%s3661_s24 + $0x18] sm:$0xff] %v2774_v62   ;;  %3110 = vst [vmem:[%s3661_s24 + $0x118] sm:$0xff] %v2934_v63   ;;  %v2769_v6 = vpack.c.bf16 %v1535_v0, %v1534_v58  ;;  %v2929_v7 = vpack.c.bf16 %v1599_v1, %v1598_v59  ;;  %v1403_v9 = vmul.f32 %v3635_v8, %v909_v4 }
 0x101   : > { %v1467_v10 = vmul.f32 %v3635_v8, %v1165_v5  ;;  %v3238_v11 = vpop.f32.mrf.mxu0  ;;  %v3302_v12 = vpop.f32.mrf.mxu1  ;;  %v1540_v16 = vadd.f32 %v3642_v15, %v1405_v2  ;;  %v1604_v17 = vadd.f32 %v3642_v15, %v1469_v3 }
 0x102   : > { %3077 = vst [vmem:[%s3661_s24 + $0x10] sm:$0xff] %v2769_v6   ;;  %3109 = vst [vmem:[%s3661_s24 + $0x110] sm:$0xff] %v2929_v7   ;;  %v1406_v13 = vmul.f32 %v3238_v11, %v3635_v8  ;;  %v1470_v14 = vmul.f32 %v3302_v12, %v3635_v8  ;;  %v1538_v24 = vadd.f32 %v3642_v15, %v1403_v9 }
 0x103   : > { %v912_v18 = vpop.f32.mrf.mxu0  ;;  %v1168_v19 = vpop.f32.mrf.mxu1  ;;  %v1602_v25 = vadd.f32 %v3642_v15, %v1467_v10 }
 0x104   : > { %v1541_v20 = vadd.f32 %v3642_v15, %v1406_v13  ;;  %v1605_v21 = vadd.f32 %v3642_v15, %v1470_v14  ;;  %v1404_v22 = vmul.f32 %v3635_v8, %v912_v18  ;;  %v1468_v23 = vmul.f32 %v3635_v8, %v1168_v19 }
 0x105   : > { %v3241_v26 = vpop.f32.mrf.mxu0  ;;  %v3305_v27 = vpop.f32.mrf.mxu1 }
 0x106   : > { %v2784_v28 = vpack.c.bf16 %v1541_v20, %v1540_v16  ;;  %v2944_v29 = vpack.c.bf16 %v1605_v21, %v1604_v17  ;;  %v1539_v30 = vadd.f32 %v3642_v15, %v1404_v22  ;;  %v1603_v31 = vadd.f32 %v3642_v15, %v1468_v23 }
 0x107   : > { %v1409_v32 = vmul.f32 %v3241_v26, %v3635_v8  ;;  %v1473_v33 = vmul.f32 %v3305_v27, %v3635_v8  ;;  %v925_v34 = vpop.f32.mrf.mxu0  ;;  %v1181_v35 = vpop.f32.mrf.mxu1 }
 0x108   : > { %3080 = vst [vmem:[%s3661_s24 + $0x28] sm:$0xff] %v2784_v28   ;;  %3112 = vst [vmem:[%s3661_s24 + $0x128] sm:$0xff] %v2944_v29   ;;  %v2779_v36 = vpack.c.bf16 %v1539_v30, %v1538_v24  ;;  %v2939_v37 = vpack.c.bf16 %v1603_v31, %v1602_v25  ;;  %v1407_v38 = vmul.f32 %v3635_v8, %v925_v34 }
 0x109   : > { %v1471_v39 = vmul.f32 %v3635_v8, %v1181_v35  ;;  %v3242_v40 = vpop.f32.mrf.mxu0  ;;  %v3306_v41 = vpop.f32.mrf.mxu1  ;;  %v1544_v44 = vadd.f32 %v3642_v15, %v1409_v32  ;;  %v1608_v45 = vadd.f32 %v3642_v15, %v1473_v33 }
 0x10a   : > { %3079 = vst [vmem:[%s3661_s24 + $0x20] sm:$0xff] %v2779_v36   ;;  %3111 = vst [vmem:[%s3661_s24 + $0x120] sm:$0xff] %v2939_v37   ;;  %v1410_v42 = vmul.f32 %v3242_v40, %v3635_v8  ;;  %v1474_v43 = vmul.f32 %v3306_v41, %v3635_v8  ;;  %v1542_v52 = vadd.f32 %v3642_v15, %v1407_v38 }
 0x10b   : > { %v928_v46 = vpop.f32.mrf.mxu0  ;;  %v1184_v47 = vpop.f32.mrf.mxu1  ;;  %v1606_v53 = vadd.f32 %v3642_v15, %v1471_v39 }
 0x10c   : > { %v1545_v48 = vadd.f32 %v3642_v15, %v1410_v42  ;;  %v1609_v49 = vadd.f32 %v3642_v15, %v1474_v43  ;;  %v1408_v50 = vmul.f32 %v3635_v8, %v928_v46  ;;  %v1472_v51 = vmul.f32 %v3635_v8, %v1184_v47 }
 0x10d   : > { %v3245_v54 = vpop.f32.mrf.mxu0  ;;  %v3309_v55 = vpop.f32.mrf.mxu1 }
 0x10e   : > { %v2794_v56 = vpack.c.bf16 %v1545_v48, %v1544_v44  ;;  %v2954_v57 = vpack.c.bf16 %v1609_v49, %v1608_v45  ;;  %v1543_v58 = vadd.f32 %v3642_v15, %v1408_v50  ;;  %v1607_v59 = vadd.f32 %v3642_v15, %v1472_v51 }
 0x10f   : > { %v1413_v60 = vmul.f32 %v3245_v54, %v3635_v8  ;;  %v1477_v61 = vmul.f32 %v3309_v55, %v3635_v8  ;;  %v941_v62 = vpop.f32.mrf.mxu0  ;;  %v1197_v63 = vpop.f32.mrf.mxu1 }
 0x110   : > { %3082 = vst [vmem:[%s3661_s24 + $0x38] sm:$0xff] %v2794_v56   ;;  %3114 = vst [vmem:[%s3661_s24 + $0x138] sm:$0xff] %v2954_v57   ;;  %v2789_v0 = vpack.c.bf16 %v1543_v58, %v1542_v52  ;;  %v2949_v1 = vpack.c.bf16 %v1607_v59, %v1606_v53  ;;  %v1411_v2 = vmul.f32 %v3635_v8, %v941_v62 }
 0x111   : > { %v1475_v3 = vmul.f32 %v3635_v8, %v1197_v63  ;;  %v3246_v4 = vpop.f32.mrf.mxu0  ;;  %v3310_v5 = vpop.f32.mrf.mxu1  ;;  %v1548_v9 = vadd.f32 %v3642_v15, %v1413_v60  ;;  %v1612_v10 = vadd.f32 %v3642_v15, %v1477_v61 }
 0x112   : > { %3081 = vst [vmem:[%s3661_s24 + $0x30] sm:$0xff] %v2789_v0   ;;  %3113 = vst [vmem:[%s3661_s24 + $0x130] sm:$0xff] %v2949_v1   ;;  %v1414_v6 = vmul.f32 %v3246_v4, %v3635_v8  ;;  %v1478_v7 = vmul.f32 %v3310_v5, %v3635_v8  ;;  %v1546_v18 = vadd.f32 %v3642_v15, %v1411_v2 }
 0x113   : > { %v944_v11 = vpop.f32.mrf.mxu0  ;;  %v1200_v12 = vpop.f32.mrf.mxu1  ;;  %v1610_v19 = vadd.f32 %v3642_v15, %v1475_v3 }
 0x114   : > { %v1549_v13 = vadd.f32 %v3642_v15, %v1414_v6  ;;  %v1613_v14 = vadd.f32 %v3642_v15, %v1478_v7  ;;  %v1412_v16 = vmul.f32 %v3635_v8, %v944_v11  ;;  %v1476_v17 = vmul.f32 %v3635_v8, %v1200_v12 }
 0x115   : > { %v3249_v20 = vpop.f32.mrf.mxu0  ;;  %v3313_v21 = vpop.f32.mrf.mxu1 }
 0x116   : > { %v2804_v22 = vpack.c.bf16 %v1549_v13, %v1548_v9  ;;  %v2964_v23 = vpack.c.bf16 %v1613_v14, %v1612_v10  ;;  %v1547_v24 = vadd.f32 %v3642_v15, %v1412_v16  ;;  %v1611_v25 = vadd.f32 %v3642_v15, %v1476_v17 }
 0x117   : > { %v1417_v26 = vmul.f32 %v3249_v20, %v3635_v8  ;;  %v1481_v27 = vmul.f32 %v3313_v21, %v3635_v8  ;;  %v957_v28 = vpop.f32.mrf.mxu0  ;;  %v1213_v29 = vpop.f32.mrf.mxu1 }
 0x118   : > { %3084 = vst [vmem:[%s3661_s24 + $0x48] sm:$0xff] %v2804_v22   ;;  %3116 = vst [vmem:[%s3661_s24 + $0x148] sm:$0xff] %v2964_v23   ;;  %v2799_v30 = vpack.c.bf16 %v1547_v24, %v1546_v18  ;;  %v2959_v31 = vpack.c.bf16 %v1611_v25, %v1610_v19  ;;  %v1415_v32 = vmul.f32 %v3635_v8, %v957_v28 }
 0x119   : > { %v1479_v33 = vmul.f32 %v3635_v8, %v1213_v29  ;;  %v3250_v34 = vpop.f32.mrf.mxu0  ;;  %v3314_v35 = vpop.f32.mrf.mxu1  ;;  %v1552_v38 = vadd.f32 %v3642_v15, %v1417_v26  ;;  %v1616_v39 = vadd.f32 %v3642_v15, %v1481_v27 }
 0x11a   : > { %3083 = vst [vmem:[%s3661_s24 + $0x40] sm:$0xff] %v2799_v30   ;;  %3115 = vst [vmem:[%s3661_s24 + $0x140] sm:$0xff] %v2959_v31   ;;  %v1418_v36 = vmul.f32 %v3250_v34, %v3635_v8  ;;  %v1482_v37 = vmul.f32 %v3314_v35, %v3635_v8  ;;  %v1550_v46 = vadd.f32 %v3642_v15, %v1415_v32 }
 0x11b   : > { %v960_v40 = vpop.f32.mrf.mxu0  ;;  %v1216_v41 = vpop.f32.mrf.mxu1  ;;  %v1614_v47 = vadd.f32 %v3642_v15, %v1479_v33 }
 0x11c   : > { %v1553_v42 = vadd.f32 %v3642_v15, %v1418_v36  ;;  %v1617_v43 = vadd.f32 %v3642_v15, %v1482_v37  ;;  %v1416_v44 = vmul.f32 %v3635_v8, %v960_v40  ;;  %v1480_v45 = vmul.f32 %v3635_v8, %v1216_v41 }
 0x11d   : > { %v3253_v48 = vpop.f32.mrf.mxu0  ;;  %v3317_v49 = vpop.f32.mrf.mxu1 }
 0x11e   : > { %v2814_v50 = vpack.c.bf16 %v1553_v42, %v1552_v38  ;;  %v2974_v51 = vpack.c.bf16 %v1617_v43, %v1616_v39  ;;  %v1551_v52 = vadd.f32 %v3642_v15, %v1416_v44  ;;  %v1615_v53 = vadd.f32 %v3642_v15, %v1480_v45 }
 0x11f   : > { %v1421_v54 = vmul.f32 %v3253_v48, %v3635_v8  ;;  %v1485_v55 = vmul.f32 %v3317_v49, %v3635_v8  ;;  %v973_v56 = vpop.f32.mrf.mxu0  ;;  %v1229_v57 = vpop.f32.mrf.mxu1 }
 0x120   : > { %3086 = vst [vmem:[%s3661_s24 + $0x58] sm:$0xff] %v2814_v50   ;;  %3118 = vst [vmem:[%s3661_s24 + $0x158] sm:$0xff] %v2974_v51   ;;  %v2809_v58 = vpack.c.bf16 %v1551_v52, %v1550_v46  ;;  %v2969_v59 = vpack.c.bf16 %v1615_v53, %v1614_v47  ;;  %v1419_v60 = vmul.f32 %v3635_v8, %v973_v56 }
 0x121   : > { %v1483_v61 = vmul.f32 %v3635_v8, %v1229_v57  ;;  %v3254_v62 = vpop.f32.mrf.mxu0  ;;  %v3318_v63 = vpop.f32.mrf.mxu1  ;;  %v1556_v2 = vadd.f32 %v3642_v15, %v1421_v54  ;;  %v1620_v3 = vadd.f32 %v3642_v15, %v1485_v55 }
 0x122   : > { %3085 = vst [vmem:[%s3661_s24 + $0x50] sm:$0xff] %v2809_v58   ;;  %3117 = vst [vmem:[%s3661_s24 + $0x150] sm:$0xff] %v2969_v59   ;;  %v1422_v0 = vmul.f32 %v3254_v62, %v3635_v8  ;;  %v1486_v1 = vmul.f32 %v3318_v63, %v3635_v8  ;;  %v1554_v11 = vadd.f32 %v3642_v15, %v1419_v60 }
 0x123   : > { %v976_v4 = vpop.f32.mrf.mxu0  ;;  %v1232_v5 = vpop.f32.mrf.mxu1  ;;  %v1618_v12 = vadd.f32 %v3642_v15, %v1483_v61 }
 0x124   : > { %v1557_v6 = vadd.f32 %v3642_v15, %v1422_v0  ;;  %v1621_v7 = vadd.f32 %v3642_v15, %v1486_v1  ;;  %v1420_v9 = vmul.f32 %v3635_v8, %v976_v4  ;;  %v1484_v10 = vmul.f32 %v3635_v8, %v1232_v5 }
 0x125   : > { %v3257_v13 = vpop.f32.mrf.mxu0  ;;  %v3321_v14 = vpop.f32.mrf.mxu1 }
 0x126   : > { %v2824_v16 = vpack.c.bf16 %v1557_v6, %v1556_v2  ;;  %v2984_v17 = vpack.c.bf16 %v1621_v7, %v1620_v3  ;;  %v1555_v18 = vadd.f32 %v3642_v15, %v1420_v9  ;;  %v1619_v19 = vadd.f32 %v3642_v15, %v1484_v10 }
 0x127   : > { %v1425_v20 = vmul.f32 %v3257_v13, %v3635_v8  ;;  %v1489_v21 = vmul.f32 %v3321_v14, %v3635_v8  ;;  %v989_v22 = vpop.f32.mrf.mxu0  ;;  %v1245_v23 = vpop.f32.mrf.mxu1 }
 0x128   : > { %3088 = vst [vmem:[%s3661_s24 + $0x68] sm:$0xff] %v2824_v16   ;;  %3120 = vst [vmem:[%s3661_s24 + $0x168] sm:$0xff] %v2984_v17   ;;  %v2819_v24 = vpack.c.bf16 %v1555_v18, %v1554_v11  ;;  %v2979_v25 = vpack.c.bf16 %v1619_v19, %v1618_v12  ;;  %v1423_v26 = vmul.f32 %v3635_v8, %v989_v22 }
 0x129   : > { %v1487_v27 = vmul.f32 %v3635_v8, %v1245_v23  ;;  %v3258_v28 = vpop.f32.mrf.mxu0  ;;  %v3322_v29 = vpop.f32.mrf.mxu1  ;;  %v1560_v32 = vadd.f32 %v3642_v15, %v1425_v20  ;;  %v1624_v33 = vadd.f32 %v3642_v15, %v1489_v21 }
 0x12a   : > { %3087 = vst [vmem:[%s3661_s24 + $0x60] sm:$0xff] %v2819_v24   ;;  %3119 = vst [vmem:[%s3661_s24 + $0x160] sm:$0xff] %v2979_v25   ;;  %v1426_v30 = vmul.f32 %v3258_v28, %v3635_v8  ;;  %v1490_v31 = vmul.f32 %v3322_v29, %v3635_v8  ;;  %v1558_v40 = vadd.f32 %v3642_v15, %v1423_v26 }
 0x12b   : > { %v992_v34 = vpop.f32.mrf.mxu0  ;;  %v1248_v35 = vpop.f32.mrf.mxu1  ;;  %v1622_v41 = vadd.f32 %v3642_v15, %v1487_v27 }
 0x12c   : > { %v1561_v36 = vadd.f32 %v3642_v15, %v1426_v30  ;;  %v1625_v37 = vadd.f32 %v3642_v15, %v1490_v31  ;;  %v1424_v38 = vmul.f32 %v3635_v8, %v992_v34  ;;  %v1488_v39 = vmul.f32 %v3635_v8, %v1248_v35 }
 0x12d   : > { %v3261_v42 = vpop.f32.mrf.mxu0  ;;  %v3325_v43 = vpop.f32.mrf.mxu1 }
 0x12e   : > { %v2834_v44 = vpack.c.bf16 %v1561_v36, %v1560_v32  ;;  %v2994_v45 = vpack.c.bf16 %v1625_v37, %v1624_v33  ;;  %v1559_v46 = vadd.f32 %v3642_v15, %v1424_v38  ;;  %v1623_v47 = vadd.f32 %v3642_v15, %v1488_v39 }
 0x12f   : > { %v1429_v48 = vmul.f32 %v3261_v42, %v3635_v8  ;;  %v1493_v49 = vmul.f32 %v3325_v43, %v3635_v8  ;;  %v1005_v50 = vpop.f32.mrf.mxu0  ;;  %v1261_v51 = vpop.f32.mrf.mxu1 }
 0x130   : > { %3090 = vst [vmem:[%s3661_s24 + $0x78] sm:$0xff] %v2834_v44   ;;  %3122 = vst [vmem:[%s3661_s24 + $0x178] sm:$0xff] %v2994_v45   ;;  %v2829_v52 = vpack.c.bf16 %v1559_v46, %v1558_v40  ;;  %v2989_v53 = vpack.c.bf16 %v1623_v47, %v1622_v41  ;;  %v1427_v54 = vmul.f32 %v3635_v8, %v1005_v50 }
 0x131   : > { %v1491_v55 = vmul.f32 %v3635_v8, %v1261_v51  ;;  %v3262_v56 = vpop.f32.mrf.mxu0  ;;  %v3326_v57 = vpop.f32.mrf.mxu1  ;;  %v1564_v60 = vadd.f32 %v3642_v15, %v1429_v48  ;;  %v1628_v61 = vadd.f32 %v3642_v15, %v1493_v49 }
 0x132   : > { %3089 = vst [vmem:[%s3661_s24 + $0x70] sm:$0xff] %v2829_v52   ;;  %3121 = vst [vmem:[%s3661_s24 + $0x170] sm:$0xff] %v2989_v53   ;;  %v1430_v58 = vmul.f32 %v3262_v56, %v3635_v8  ;;  %v1494_v59 = vmul.f32 %v3326_v57, %v3635_v8  ;;  %v1562_v4 = vadd.f32 %v3642_v15, %v1427_v54 }
 0x133   : > { %v1008_v62 = vpop.f32.mrf.mxu0  ;;  %v1264_v63 = vpop.f32.mrf.mxu1  ;;  %v1626_v5 = vadd.f32 %v3642_v15, %v1491_v55 }
 0x134   : > { %v1565_v0 = vadd.f32 %v3642_v15, %v1430_v58  ;;  %v1629_v1 = vadd.f32 %v3642_v15, %v1494_v59  ;;  %v1428_v2 = vmul.f32 %v3635_v8, %v1008_v62  ;;  %v1492_v3 = vmul.f32 %v3635_v8, %v1264_v63 }
 0x135   : > { %v3265_v6 = vpop.f32.mrf.mxu0  ;;  %v3329_v7 = vpop.f32.mrf.mxu1 }
 0x136   : > { %v2844_v9 = vpack.c.bf16 %v1565_v0, %v1564_v60  ;;  %v3004_v10 = vpack.c.bf16 %v1629_v1, %v1628_v61  ;;  %v1563_v11 = vadd.f32 %v3642_v15, %v1428_v2  ;;  %v1627_v12 = vadd.f32 %v3642_v15, %v1492_v3 }
 0x137   : > { %v1433_v13 = vmul.f32 %v3265_v6, %v3635_v8  ;;  %v1497_v14 = vmul.f32 %v3329_v7, %v3635_v8  ;;  %v1021_v16 = vpop.f32.mrf.mxu0  ;;  %v1277_v17 = vpop.f32.mrf.mxu1 }
 0x138   : > { %3092 = vst [vmem:[%s3661_s24 + $0x88] sm:$0xff] %v2844_v9   ;;  %3124 = vst [vmem:[%s3661_s24 + $0x188] sm:$0xff] %v3004_v10   ;;  %v2839_v18 = vpack.c.bf16 %v1563_v11, %v1562_v4  ;;  %v2999_v19 = vpack.c.bf16 %v1627_v12, %v1626_v5  ;;  %v1431_v20 = vmul.f32 %v3635_v8, %v1021_v16 }
 0x139   : > { %v1495_v21 = vmul.f32 %v3635_v8, %v1277_v17  ;;  %v3266_v22 = vpop.f32.mrf.mxu0  ;;  %v3330_v23 = vpop.f32.mrf.mxu1  ;;  %v1568_v26 = vadd.f32 %v3642_v15, %v1433_v13  ;;  %v1632_v27 = vadd.f32 %v3642_v15, %v1497_v14 }
 0x13a   : > { %3091 = vst [vmem:[%s3661_s24 + $0x80] sm:$0xff] %v2839_v18   ;;  %3123 = vst [vmem:[%s3661_s24 + $0x180] sm:$0xff] %v2999_v19   ;;  %v1434_v24 = vmul.f32 %v3266_v22, %v3635_v8  ;;  %v1498_v25 = vmul.f32 %v3330_v23, %v3635_v8  ;;  %v1566_v34 = vadd.f32 %v3642_v15, %v1431_v20 }
 0x13b   : > { %v1024_v28 = vpop.f32.mrf.mxu0  ;;  %v1280_v29 = vpop.f32.mrf.mxu1  ;;  %v1630_v35 = vadd.f32 %v3642_v15, %v1495_v21 }
 0x13c   : > { %v1569_v30 = vadd.f32 %v3642_v15, %v1434_v24  ;;  %v1633_v31 = vadd.f32 %v3642_v15, %v1498_v25  ;;  %v1432_v32 = vmul.f32 %v3635_v8, %v1024_v28  ;;  %v1496_v33 = vmul.f32 %v3635_v8, %v1280_v29 }
 0x13d   : > { %v3269_v36 = vpop.f32.mrf.mxu0  ;;  %v3333_v37 = vpop.f32.mrf.mxu1 }
 0x13e   : > { %v2854_v38 = vpack.c.bf16 %v1569_v30, %v1568_v26  ;;  %v3014_v39 = vpack.c.bf16 %v1633_v31, %v1632_v27  ;;  %v1567_v40 = vadd.f32 %v3642_v15, %v1432_v32  ;;  %v1631_v41 = vadd.f32 %v3642_v15, %v1496_v33 }
 0x13f   : > { %v1437_v42 = vmul.f32 %v3269_v36, %v3635_v8  ;;  %v1501_v43 = vmul.f32 %v3333_v37, %v3635_v8  ;;  %v1037_v44 = vpop.f32.mrf.mxu0  ;;  %v1293_v45 = vpop.f32.mrf.mxu1 }
 0x140   : > { %3094 = vst [vmem:[%s3661_s24 + $0x98] sm:$0xff] %v2854_v38   ;;  %3126 = vst [vmem:[%s3661_s24 + $0x198] sm:$0xff] %v3014_v39   ;;  %v2849_v46 = vpack.c.bf16 %v1567_v40, %v1566_v34  ;;  %v3009_v47 = vpack.c.bf16 %v1631_v41, %v1630_v35  ;;  %v1435_v48 = vmul.f32 %v3635_v8, %v1037_v44 }
 0x141   : > { %v1499_v49 = vmul.f32 %v3635_v8, %v1293_v45  ;;  %v3270_v50 = vpop.f32.mrf.mxu0  ;;  %v3334_v51 = vpop.f32.mrf.mxu1  ;;  %v1572_v54 = vadd.f32 %v3642_v15, %v1437_v42  ;;  %v1636_v55 = vadd.f32 %v3642_v15, %v1501_v43 }
 0x142   : > { %3093 = vst [vmem:[%s3661_s24 + $0x90] sm:$0xff] %v2849_v46   ;;  %3125 = vst [vmem:[%s3661_s24 + $0x190] sm:$0xff] %v3009_v47   ;;  %v1438_v52 = vmul.f32 %v3270_v50, %v3635_v8  ;;  %v1502_v53 = vmul.f32 %v3334_v51, %v3635_v8  ;;  %v1570_v62 = vadd.f32 %v3642_v15, %v1435_v48 }
 0x143   : > { %v1040_v56 = vpop.f32.mrf.mxu0  ;;  %v1296_v57 = vpop.f32.mrf.mxu1  ;;  %v1634_v63 = vadd.f32 %v3642_v15, %v1499_v49 }
 0x144   : > { %v1573_v58 = vadd.f32 %v3642_v15, %v1438_v52  ;;  %v1637_v59 = vadd.f32 %v3642_v15, %v1502_v53  ;;  %v1436_v60 = vmul.f32 %v3635_v8, %v1040_v56  ;;  %v1500_v61 = vmul.f32 %v3635_v8, %v1296_v57 }
 0x145   : > { %v3273_v0 = vpop.f32.mrf.mxu0  ;;  %v3337_v1 = vpop.f32.mrf.mxu1 }
 0x146   : > { %v2864_v2 = vpack.c.bf16 %v1573_v58, %v1572_v54  ;;  %v3024_v3 = vpack.c.bf16 %v1637_v59, %v1636_v55  ;;  %v1571_v4 = vadd.f32 %v3642_v15, %v1436_v60  ;;  %v1635_v5 = vadd.f32 %v3642_v15, %v1500_v61 }
 0x147   : > { %v1441_v6 = vmul.f32 %v3273_v0, %v3635_v8  ;;  %v1505_v7 = vmul.f32 %v3337_v1, %v3635_v8  ;;  %v1053_v9 = vpop.f32.mrf.mxu0  ;;  %v1309_v10 = vpop.f32.mrf.mxu1 }
 0x148   : > { %3096 = vst [vmem:[%s3661_s24 + $0xa8] sm:$0xff] %v2864_v2   ;;  %3128 = vst [vmem:[%s3661_s24 + $0x1a8] sm:$0xff] %v3024_v3   ;;  %v2859_v11 = vpack.c.bf16 %v1571_v4, %v1570_v62  ;;  %v3019_v12 = vpack.c.bf16 %v1635_v5, %v1634_v63  ;;  %v1439_v13 = vmul.f32 %v3635_v8, %v1053_v9 }
 0x149   : > { %v1503_v14 = vmul.f32 %v3635_v8, %v1309_v10  ;;  %v3274_v16 = vpop.f32.mrf.mxu0  ;;  %v3338_v17 = vpop.f32.mrf.mxu1  ;;  %v1576_v20 = vadd.f32 %v3642_v15, %v1441_v6  ;;  %v1640_v21 = vadd.f32 %v3642_v15, %v1505_v7 }
 0x14a   : > { %3095 = vst [vmem:[%s3661_s24 + $0xa0] sm:$0xff] %v2859_v11   ;;  %3127 = vst [vmem:[%s3661_s24 + $0x1a0] sm:$0xff] %v3019_v12   ;;  %v1442_v18 = vmul.f32 %v3274_v16, %v3635_v8  ;;  %v1506_v19 = vmul.f32 %v3338_v17, %v3635_v8  ;;  %v1574_v28 = vadd.f32 %v3642_v15, %v1439_v13 }
 0x14b   : > { %v1056_v22 = vpop.f32.mrf.mxu0  ;;  %v1312_v23 = vpop.f32.mrf.mxu1  ;;  %v1638_v29 = vadd.f32 %v3642_v15, %v1503_v14 }
 0x14c   : > { %v1577_v24 = vadd.f32 %v3642_v15, %v1442_v18  ;;  %v1641_v25 = vadd.f32 %v3642_v15, %v1506_v19  ;;  %v1440_v26 = vmul.f32 %v3635_v8, %v1056_v22  ;;  %v1504_v27 = vmul.f32 %v3635_v8, %v1312_v23 }
 0x14d   : > { %v3277_v30 = vpop.f32.mrf.mxu0  ;;  %v3341_v31 = vpop.f32.mrf.mxu1 }
 0x14e   : > { %v2874_v32 = vpack.c.bf16 %v1577_v24, %v1576_v20  ;;  %v3034_v33 = vpack.c.bf16 %v1641_v25, %v1640_v21  ;;  %v1575_v34 = vadd.f32 %v3642_v15, %v1440_v26  ;;  %v1639_v35 = vadd.f32 %v3642_v15, %v1504_v27 }
 0x14f   : > { %v1445_v36 = vmul.f32 %v3277_v30, %v3635_v8  ;;  %v1509_v37 = vmul.f32 %v3341_v31, %v3635_v8  ;;  %v1069_v38 = vpop.f32.mrf.mxu0  ;;  %v1325_v39 = vpop.f32.mrf.mxu1 }
 0x150   : > { %3098 = vst [vmem:[%s3661_s24 + $0xb8] sm:$0xff] %v2874_v32   ;;  %3130 = vst [vmem:[%s3661_s24 + $0x1b8] sm:$0xff] %v3034_v33   ;;  %v2869_v40 = vpack.c.bf16 %v1575_v34, %v1574_v28  ;;  %v3029_v41 = vpack.c.bf16 %v1639_v35, %v1638_v29  ;;  %v1443_v42 = vmul.f32 %v3635_v8, %v1069_v38 }
 0x151   : > { %v1507_v43 = vmul.f32 %v3635_v8, %v1325_v39  ;;  %v3278_v44 = vpop.f32.mrf.mxu0  ;;  %v3342_v45 = vpop.f32.mrf.mxu1  ;;  %v1580_v48 = vadd.f32 %v3642_v15, %v1445_v36  ;;  %v1644_v49 = vadd.f32 %v3642_v15, %v1509_v37 }
 0x152   : > { %3097 = vst [vmem:[%s3661_s24 + $0xb0] sm:$0xff] %v2869_v40   ;;  %3129 = vst [vmem:[%s3661_s24 + $0x1b0] sm:$0xff] %v3029_v41   ;;  %v1446_v46 = vmul.f32 %v3278_v44, %v3635_v8  ;;  %v1510_v47 = vmul.f32 %v3342_v45, %v3635_v8  ;;  %v1578_v56 = vadd.f32 %v3642_v15, %v1443_v42 }
 0x153   : > { %v1072_v50 = vpop.f32.mrf.mxu0  ;;  %v1328_v51 = vpop.f32.mrf.mxu1  ;;  %v1642_v57 = vadd.f32 %v3642_v15, %v1507_v43 }
 0x154   : > { %v1581_v52 = vadd.f32 %v3642_v15, %v1446_v46  ;;  %v1645_v53 = vadd.f32 %v3642_v15, %v1510_v47  ;;  %v1444_v54 = vmul.f32 %v3635_v8, %v1072_v50  ;;  %v1508_v55 = vmul.f32 %v3635_v8, %v1328_v51 }
 0x155   : > { %v3281_v58 = vpop.f32.mrf.mxu0  ;;  %v3345_v59 = vpop.f32.mrf.mxu1 }
 0x156   : > { %v2884_v60 = vpack.c.bf16 %v1581_v52, %v1580_v48  ;;  %v3044_v61 = vpack.c.bf16 %v1645_v53, %v1644_v49  ;;  %v1579_v62 = vadd.f32 %v3642_v15, %v1444_v54  ;;  %v1643_v63 = vadd.f32 %v3642_v15, %v1508_v55 }
 0x157   : > { %v1449_v0 = vmul.f32 %v3281_v58, %v3635_v8  ;;  %v1513_v1 = vmul.f32 %v3345_v59, %v3635_v8  ;;  %v1085_v2 = vpop.f32.mrf.mxu0  ;;  %v1341_v3 = vpop.f32.mrf.mxu1 }
 0x158   : > { %3100 = vst [vmem:[%s3661_s24 + $0xc8] sm:$0xff] %v2884_v60   ;;  %3132 = vst [vmem:[%s3661_s24 + $0x1c8] sm:$0xff] %v3044_v61   ;;  %v2879_v4 = vpack.c.bf16 %v1579_v62, %v1578_v56  ;;  %v3039_v5 = vpack.c.bf16 %v1643_v63, %v1642_v57  ;;  %v1447_v6 = vmul.f32 %v3635_v8, %v1085_v2 }
 0x159   : > { %v1511_v7 = vmul.f32 %v3635_v8, %v1341_v3  ;;  %v3282_v9 = vpop.f32.mrf.mxu0  ;;  %v3346_v10 = vpop.f32.mrf.mxu1  ;;  %v1584_v13 = vadd.f32 %v3642_v15, %v1449_v0  ;;  %v1648_v14 = vadd.f32 %v3642_v15, %v1513_v1 }
 0x15a   : > { %3099 = vst [vmem:[%s3661_s24 + $0xc0] sm:$0xff] %v2879_v4   ;;  %3131 = vst [vmem:[%s3661_s24 + $0x1c0] sm:$0xff] %v3039_v5   ;;  %v1450_v11 = vmul.f32 %v3282_v9, %v3635_v8  ;;  %v1514_v12 = vmul.f32 %v3346_v10, %v3635_v8  ;;  %v1582_v22 = vadd.f32 %v3642_v15, %v1447_v6 }
 0x15b   : > { %v1088_v16 = vpop.f32.mrf.mxu0  ;;  %v1344_v17 = vpop.f32.mrf.mxu1  ;;  %v1646_v23 = vadd.f32 %v3642_v15, %v1511_v7 }
 0x15c   : > { %v1585_v18 = vadd.f32 %v3642_v15, %v1450_v11  ;;  %v1649_v19 = vadd.f32 %v3642_v15, %v1514_v12  ;;  %v1448_v20 = vmul.f32 %v3635_v8, %v1088_v16  ;;  %v1512_v21 = vmul.f32 %v3635_v8, %v1344_v17 }
 0x15d   : > { %v3285_v24 = vpop.f32.mrf.mxu0  ;;  %v3349_v25 = vpop.f32.mrf.mxu1 }
 0x15e   : > { %v2894_v26 = vpack.c.bf16 %v1585_v18, %v1584_v13  ;;  %v3054_v27 = vpack.c.bf16 %v1649_v19, %v1648_v14  ;;  %v1583_v28 = vadd.f32 %v3642_v15, %v1448_v20  ;;  %v1647_v29 = vadd.f32 %v3642_v15, %v1512_v21 }
 0x15f   : > { %v1453_v30 = vmul.f32 %v3285_v24, %v3635_v8  ;;  %v1517_v31 = vmul.f32 %v3349_v25, %v3635_v8  ;;  %v1101_v32 = vpop.f32.mrf.mxu0  ;;  %v1357_v33 = vpop.f32.mrf.mxu1 }
 0x160   : > { %3102 = vst [vmem:[%s3661_s24 + $0xd8] sm:$0xff] %v2894_v26   ;;  %3134 = vst [vmem:[%s3661_s24 + $0x1d8] sm:$0xff] %v3054_v27   ;;  %v2889_v34 = vpack.c.bf16 %v1583_v28, %v1582_v22  ;;  %v3049_v35 = vpack.c.bf16 %v1647_v29, %v1646_v23  ;;  %v1451_v36 = vmul.f32 %v3635_v8, %v1101_v32 }
 0x161   : > { %v1515_v37 = vmul.f32 %v3635_v8, %v1357_v33  ;;  %v3286_v38 = vpop.f32.mrf.mxu0  ;;  %v3350_v39 = vpop.f32.mrf.mxu1  ;;  %v1588_v42 = vadd.f32 %v3642_v15, %v1453_v30  ;;  %v1652_v43 = vadd.f32 %v3642_v15, %v1517_v31 }
 0x162   : > { %3101 = vst [vmem:[%s3661_s24 + $0xd0] sm:$0xff] %v2889_v34   ;;  %3133 = vst [vmem:[%s3661_s24 + $0x1d0] sm:$0xff] %v3049_v35   ;;  %v1454_v40 = vmul.f32 %v3286_v38, %v3635_v8  ;;  %v1518_v41 = vmul.f32 %v3350_v39, %v3635_v8  ;;  %v1586_v50 = vadd.f32 %v3642_v15, %v1451_v36 }
 0x163   : > { %v1104_v44 = vpop.f32.mrf.mxu0  ;;  %v1360_v45 = vpop.f32.mrf.mxu1  ;;  %v1650_v51 = vadd.f32 %v3642_v15, %v1515_v37 }
 0x164   : > { %v1589_v46 = vadd.f32 %v3642_v15, %v1454_v40  ;;  %v1653_v47 = vadd.f32 %v3642_v15, %v1518_v41  ;;  %v1452_v48 = vmul.f32 %v3635_v8, %v1104_v44  ;;  %v1516_v49 = vmul.f32 %v3635_v8, %v1360_v45 }
 0x165   : > { %v3289_v52 = vpop.f32.mrf.mxu0  ;;  %v3353_v53 = vpop.f32.mrf.mxu1 }
 0x166   : > { %v2904_v54 = vpack.c.bf16 %v1589_v46, %v1588_v42  ;;  %v3064_v55 = vpack.c.bf16 %v1653_v47, %v1652_v43  ;;  %v1587_v56 = vadd.f32 %v3642_v15, %v1452_v48  ;;  %v1651_v57 = vadd.f32 %v3642_v15, %v1516_v49 }
 0x167   : > { %v1457_v58 = vmul.f32 %v3289_v52, %v3635_v8  ;;  %v1521_v59 = vmul.f32 %v3353_v53, %v3635_v8  ;;  %v1117_v60 = vpop.f32.mrf.mxu0  ;;  %v1373_v61 = vpop.f32.mrf.mxu1 }
 0x168   : > { %3104 = vst [vmem:[%s3661_s24 + $0xe8] sm:$0xff] %v2904_v54   ;;  %3136 = vst [vmem:[%s3661_s24 + $0x1e8] sm:$0xff] %v3064_v55   ;;  %v2899_v62 = vpack.c.bf16 %v1587_v56, %v1586_v50  ;;  %v3059_v63 = vpack.c.bf16 %v1651_v57, %v1650_v51  ;;  %v1455_v0 = vmul.f32 %v3635_v8, %v1117_v60 }
 0x169   : > { %v1519_v1 = vmul.f32 %v3635_v8, %v1373_v61  ;;  %v3290_v2 = vpop.f32.mrf.mxu0  ;;  %v3354_v3 = vpop.f32.mrf.mxu1  ;;  %v1592_v6 = vadd.f32 %v3642_v15, %v1457_v58  ;;  %v1656_v7 = vadd.f32 %v3642_v15, %v1521_v59 }
 0x16a   : > { %3103 = vst [vmem:[%s3661_s24 + $0xe0] sm:$0xff] %v2899_v62   ;;  %3135 = vst [vmem:[%s3661_s24 + $0x1e0] sm:$0xff] %v3059_v63   ;;  %v1458_v4 = vmul.f32 %v3290_v2, %v3635_v8  ;;  %v1522_v5 = vmul.f32 %v3354_v3, %v3635_v8  ;;  %v1590_v16 = vadd.f32 %v3642_v15, %v1455_v0 }
 0x16b   : > { %v1120_v9 = vpop.f32.mrf.mxu0  ;;  %v1376_v10 = vpop.f32.mrf.mxu1  ;;  %v1654_v17 = vadd.f32 %v3642_v15, %v1519_v1 }
 0x16c   : > { %v1593_v11 = vadd.f32 %v3642_v15, %v1458_v4  ;;  %v1657_v12 = vadd.f32 %v3642_v15, %v1522_v5  ;;  %v1456_v13 = vmul.f32 %v3635_v8, %v1120_v9  ;;  %v1520_v14 = vmul.f32 %v3635_v8, %v1376_v10 }
 0x16e   : > { %v2914_v18 = vpack.c.bf16 %v1593_v11, %v1592_v6  ;;  %v3074_v19 = vpack.c.bf16 %v1657_v12, %v1656_v7  ;;  %v1591_v20 = vadd.f32 %v3642_v15, %v1456_v13  ;;  %v1655_v21 = vadd.f32 %v3642_v15, %v1520_v14 }
 0x170   : > { %3106 = vst [vmem:[%s3661_s24 + $0xf8] sm:$0xff] %v2914_v18   ;;  %3138 = vst [vmem:[%s3661_s24 + $0x1f8] sm:$0xff] %v3074_v19   ;;  %v2909_v22 = vpack.c.bf16 %v1591_v20, %v1590_v16  ;;  %v3069_v23 = vpack.c.bf16 %v1655_v21, %v1654_v17 }
 0x172   : > { %3105 = vst [vmem:[%s3661_s24 + $0xf0] sm:$0xff] %v2909_v22   ;;  %3137 = vst [vmem:[%s3661_s24 + $0x1f0] sm:$0xff] %v3069_v23  }
 0x173 PF: > { %s14_s17 = sadd.s32 1, %s3489_s17   ;;  %s3983_s15 = smov %s3485_s16 }
 0x174   : > { %p11_p5 = scmp.ge.s32.totalorder %s14_s17, 6   ;;  %s3984_s16 = smov %s3986_s18 }
 0x176   :  { %13 = sbr.rel (!%p11_p5) target bundleno = 2 (0x2), region = 75 }

</bundles_post_ra>
